<compile_context>
chip_gen: v6e
topology: v6e:2x2x1
jax: 0.10.0
libtpu: 0.0.40
codegen_flags: <defaults>
</compile_context>

<pallas_src>
import functools

import jax
import jax.numpy as jnp
from jax.experimental import pallas as pl
from jax.experimental.pallas import tpu as pltpu

NODES = 100      # hidden width from the module ("nodes = 100")
H_PAD = 128      # lane-aligned hidden width (zero-padded)
IN_DIM = 8       # len(coeffs[0]) -- synthetic small feature dimension
BATCH = 256      # batch of states (2 tiles of 128 -> exercises the grid)
TILE_B = 128     # rows per grid step (fills the MXU's 128 rows)


def flowstep_kernel(x_ref, w1_ref, b1_ref, w2_ref, b2_ref, w3_ref, b3_ref, o_ref):
    # One grid step = one batch tile. Weights/biases are grid-invariant blocks
    # (constant index_map), so they are fetched once and stay in VMEM.
    x = x_ref[...]
    h1 = jnp.tanh(
        jnp.dot(x, w1_ref[...], preferred_element_type=jnp.float32) + b1_ref[...]
    )
    h2 = jnp.tanh(
        jnp.dot(h1, w2_ref[...], preferred_element_type=jnp.float32) + b2_ref[...]
    )
    out = jnp.dot(h2, w3_ref[...], preferred_element_type=jnp.float32) + b3_ref[...]
    o_ref[...] = out.astype(o_ref.dtype)


def pad_params(w1, b1, w2, b2, w3, b3, h_pad=H_PAD):
    """Zero-pad the hidden dimension to a lane-aligned width (inert padding)."""
    nodes = w1.shape[1]
    ph = h_pad - nodes
    if ph <= 0:
        return w1, b1, w2, b2, w3, b3
    w1p = jnp.pad(w1, ((0, 0), (0, ph)))
    b1p = jnp.pad(b1, ((0, 0), (0, ph)))
    w2p = jnp.pad(w2, ((0, ph), (0, ph)))
    b2p = jnp.pad(b2, ((0, 0), (0, ph)))
    w3p = jnp.pad(w3, ((0, ph), (0, 0)))
    return w1p, b1p, w2p, b2p, w3p, b3


@functools.partial(jax.jit, static_argnames=("tile_b",))
def flowstep_forward(x, w1, b1, w2, b2, w3, b3, *, tile_b=TILE_B):
    B, D = x.shape
    H = w1.shape[1]

    # Pick a batch tile; pad the batch up to a tile multiple if needed.
    tb = min(tile_b, B)
    pad_b = (-B) % tb
    if pad_b:
        x = jnp.pad(x, ((0, pad_b), (0, 0)))
    Bp = B + pad_b

    out = pl.pallas_call(
        flowstep_kernel,
        out_shape=jax.ShapeDtypeStruct((Bp, D), x.dtype),
        grid_spec=pltpu.PrefetchScalarGridSpec(
            num_scalar_prefetch=0,
            grid=(Bp // tb,),
            in_specs=[
                # Batch tile of the input (last dim == full array dim, legal).
                pl.BlockSpec((tb, D), lambda i: (i, 0)),
                # Weights / biases: constant block index -> stay resident in VMEM.
                pl.BlockSpec((D, H), lambda i: (0, 0)),
                pl.BlockSpec((1, H), lambda i: (0, 0)),
                pl.BlockSpec((H, H), lambda i: (0, 0)),
                pl.BlockSpec((1, H), lambda i: (0, 0)),
                pl.BlockSpec((H, D), lambda i: (0, 0)),
                pl.BlockSpec((1, D), lambda i: (0, 0)),
            ],
            out_specs=pl.BlockSpec((tb, D), lambda i: (i, 0)),
        ),
        compiler_params=pltpu.CompilerParams(
            dimension_semantics=("parallel",),  # batch tiles shard across TCs (v7x)
        ),
    )(x, w1, b1, w2, b2, w3, b3)

    return out[:B] if pad_b else out


def init_params(key, in_dim, nodes, dtype=jnp.float32):
    """Deterministic nn.Linear-style init: U(-1/sqrt(fan_in), 1/sqrt(fan_in))."""
    ks = jax.random.split(key, 6)

    def lin(kw, kb, fan_in, fan_out):
        bound = 1.0 / jnp.sqrt(jnp.asarray(fan_in, dtype))
        w = jax.random.uniform(kw, (fan_in, fan_out), dtype, -bound, bound)
        b = jax.random.uniform(kb, (1, fan_out), dtype, -bound, bound)
        return w, b

    w1, b1 = lin(ks[0], ks[1], in_dim, nodes)
    w2, b2 = lin(ks[2], ks[3], nodes, nodes)
    w3, b3 = lin(ks[4], ks[5], nodes, in_dim)
    return w1, b1, w2, b2, w3, b3


def flowstep_ref(x, w1, b1, w2, b2, w3, b3):
    h1 = jnp.tanh(x @ w1 + b1)
    h2 = jnp.tanh(h1 @ w2 + b2)
    return h2 @ w3 + b3


if __name__ == "__main__":
    key = jax.random.PRNGKey(0)
    k_x, k_p = jax.random.split(key)

    x = jax.random.normal(k_x, (BATCH, IN_DIM), jnp.float32)
    params = init_params(k_p, IN_DIM, NODES)          # original 100-wide params
    padded = pad_params(*params)                      # lane-aligned (128) params

    out = flowstep_forward(x, *padded)
    out = jax.block_until_ready(out)

    ref = flowstep_ref(x, *params)                    # reference uses unpadded params
    assert out.shape == (BATCH, IN_DIM)
    assert jnp.allclose(out, ref, atol=1e-5, rtol=1e-5), "mismatch vs reference"

    print("KERNEL_OK")
</pallas_src>

<mosaic_0001>
module attributes {stable_mosaic.version = 11 : i64} {
  func.func @flowstep_kernel(%arg0: i32, %arg1: memref<128x8xf32, #tpu.memory_space<vmem>>, %arg2: memref<8x128xf32, #tpu.memory_space<vmem>>, %arg3: memref<1x128xf32, #tpu.memory_space<vmem>>, %arg4: memref<128x128xf32, #tpu.memory_space<vmem>>, %arg5: memref<1x128xf32, #tpu.memory_space<vmem>>, %arg6: memref<128x8xf32, #tpu.memory_space<vmem>>, %arg7: memref<1x8xf32, #tpu.memory_space<vmem>>, %arg8: memref<128x8xf32, #tpu.memory_space<vmem>>) attributes {dimension_semantics = [#tpu.dimension_semantics<parallel>], iteration_bounds = array<i64: 2>, scalar_prefetch = 0 : i64, scratch_operands = 0 : i64, tpu.core_type = #tpu.core_type<tc>, window_params = [{transform_indices = @transform_0, window_bounds = array<i64: 128, 8>}, {pipeline_mode = #tpu.pipeline_mode<synchronous>, transform_indices = @transform_1, window_bounds = array<i64: 8, 128>}, {pipeline_mode = #tpu.pipeline_mode<synchronous>, transform_indices = @transform_2, window_bounds = array<i64: 1, 128>}, {pipeline_mode = #tpu.pipeline_mode<synchronous>, transform_indices = @transform_3, window_bounds = array<i64: 128, 128>}, {pipeline_mode = #tpu.pipeline_mode<synchronous>, transform_indices = @transform_4, window_bounds = array<i64: 1, 128>}, {pipeline_mode = #tpu.pipeline_mode<synchronous>, transform_indices = @transform_5, window_bounds = array<i64: 128, 8>}, {pipeline_mode = #tpu.pipeline_mode<synchronous>, transform_indices = @transform_6, window_bounds = array<i64: 1, 8>}, {transform_indices = @transform_7, window_bounds = array<i64: 128, 8>}]} {
    %c0 = arith.constant 0 : index
    %c0_0 = arith.constant 0 : index
    %0 = vector.load %arg1[%c0, %c0_0] : memref<128x8xf32, #tpu.memory_space<vmem>>, vector<128x8xf32>
    %c0_1 = arith.constant 0 : index
    %c0_2 = arith.constant 0 : index
    %1 = vector.load %arg2[%c0_1, %c0_2] : memref<8x128xf32, #tpu.memory_space<vmem>>, vector<8x128xf32>
    %cst = arith.constant dense<0.000000e+00> : vector<128x128xf32>
    %2 = tpu.matmul %0, %1, %cst {dimension_numbers = #tpu.dot_dimension_numbers<[1], [0], [0], [1], [0, 0, 1, 1], [], []>} : vector<128x8xf32>, vector<8x128xf32>, vector<128x128xf32> -> vector<128x128xf32>
    %c0_3 = arith.constant 0 : index
    %c0_4 = arith.constant 0 : index
    %3 = vector.load %arg3[%c0_3, %c0_4] : memref<1x128xf32, #tpu.memory_space<vmem>>, vector<1x128xf32>
    %4 = vector.broadcast %3 : vector<1x128xf32> to vector<128x128xf32>
    %5 = arith.addf %2, %4 : vector<128x128xf32>
    %6 = math.tanh %5 : vector<128x128xf32>
    %c0_5 = arith.constant 0 : index
    %c0_6 = arith.constant 0 : index
    %7 = vector.load %arg4[%c0_5, %c0_6] : memref<128x128xf32, #tpu.memory_space<vmem>>, vector<128x128xf32>
    %cst_7 = arith.constant dense<0.000000e+00> : vector<128x128xf32>
    %8 = tpu.matmul %6, %7, %cst_7 {dimension_numbers = #tpu.dot_dimension_numbers<[1], [0], [0], [1], [0, 0, 1, 1], [], []>} : vector<128x128xf32>, vector<128x128xf32>, vector<128x128xf32> -> vector<128x128xf32>
    %c0_8 = arith.constant 0 : index
    %c0_9 = arith.constant 0 : index
    %9 = vector.load %arg5[%c0_8, %c0_9] : memref<1x128xf32, #tpu.memory_space<vmem>>, vector<1x128xf32>
    %10 = vector.broadcast %9 : vector<1x128xf32> to vector<128x128xf32>
    %11 = arith.addf %8, %10 : vector<128x128xf32>
    %12 = math.tanh %11 : vector<128x128xf32>
    %c0_10 = arith.constant 0 : index
    %c0_11 = arith.constant 0 : index
    %13 = vector.load %arg6[%c0_10, %c0_11] : memref<128x8xf32, #tpu.memory_space<vmem>>, vector<128x8xf32>
    %cst_12 = arith.constant dense<0.000000e+00> : vector<128x8xf32>
    %14 = tpu.matmul %12, %13, %cst_12 {dimension_numbers = #tpu.dot_dimension_numbers<[1], [0], [0], [1], [0, 0, 1, 1], [], []>} : vector<128x128xf32>, vector<128x8xf32>, vector<128x8xf32> -> vector<128x8xf32>
    %c0_13 = arith.constant 0 : index
    %c0_14 = arith.constant 0 : index
    %15 = vector.load %arg7[%c0_13, %c0_14] : memref<1x8xf32, #tpu.memory_space<vmem>>, vector<1x8xf32>
    %16 = vector.broadcast %15 : vector<1x8xf32> to vector<128x8xf32>
    %17 = arith.addf %14, %16 : vector<128x8xf32>
    %c0_15 = arith.constant 0 : index
    %c0_16 = arith.constant 0 : index
    %18 = vector.load %arg8[%c0_15, %c0_16] : memref<128x8xf32, #tpu.memory_space<vmem>>, vector<128x8xf32>
    tpu.vector_store %arg8[%c0_15, %c0_16], %17 {strides = array<i32>} : memref<128x8xf32, #tpu.memory_space<vmem>>, vector<128x8xf32>,
    return
  }
  func.func @transform_0(%arg0: i32) -> (i32, i32) {
    %c0_i32 = arith.constant 0 : i32
    %c0_i32_0 = arith.constant 0 : i32
    return %arg0, %c0_i32 : i32, i32
  }
  func.func @transform_1(%arg0: i32) -> (i32, i32) {
    %c0_i32 = arith.constant 0 : i32
    %c0_i32_0 = arith.constant 0 : i32
    %c0_i32_1 = arith.constant 0 : i32
    return %c0_i32, %c0_i32_0 : i32, i32
  }
  func.func @transform_2(%arg0: i32) -> (i32, i32) {
    %c0_i32 = arith.constant 0 : i32
    %c0_i32_0 = arith.constant 0 : i32
    %c0_i32_1 = arith.constant 0 : i32
    return %c0_i32, %c0_i32_0 : i32, i32
  }
  func.func @transform_3(%arg0: i32) -> (i32, i32) {
    %c0_i32 = arith.constant 0 : i32
    %c0_i32_0 = arith.constant 0 : i32
    %c0_i32_1 = arith.constant 0 : i32
    return %c0_i32, %c0_i32_0 : i32, i32
  }
  func.func @transform_4(%arg0: i32) -> (i32, i32) {
    %c0_i32 = arith.constant 0 : i32
    %c0_i32_0 = arith.constant 0 : i32
    %c0_i32_1 = arith.constant 0 : i32
    return %c0_i32, %c0_i32_0 : i32, i32
  }
  func.func @transform_5(%arg0: i32) -> (i32, i32) {
    %c0_i32 = arith.constant 0 : i32
    %c0_i32_0 = arith.constant 0 : i32
    %c0_i32_1 = arith.constant 0 : i32
    return %c0_i32, %c0_i32_0 : i32, i32
  }
  func.func @transform_6(%arg0: i32) -> (i32, i32) {
    %c0_i32 = arith.constant 0 : i32
    %c0_i32_0 = arith.constant 0 : i32
    %c0_i32_1 = arith.constant 0 : i32
    return %c0_i32, %c0_i32_0 : i32, i32
  }
  func.func @transform_7(%arg0: i32) -> (i32, i32) {
    %c0_i32 = arith.constant 0 : i32
    %c0_i32_0 = arith.constant 0 : i32
    return %arg0, %c0_i32 : i32, i32
  }
}

</mosaic_0001>

<bundles_post_ra>
// kernel: flowstep_forward.1
= control target key start
LH: loop header
LB: loop body
LE: loop exit
PB: predicated region body
PF: predicated region fallthrough
CT: control target
= control target key end

     0   :  { %s1309_s24 = smov 0   ;;  %s1509_s0 = inlined_call_operand.vmem [shape: f32[256,8], index: 0, kind: input, shape index: {}]   ;;  %s1510_s1 = inlined_call_operand.vmem [shape: f32[8,128], index: 1, kind: input, shape index: {}]   ;;  %s1511_s2 = inlined_call_operand.vmem [shape: f32[1,128], index: 2, kind: input, shape index: {}]   ;;  %s1512_s3 = inlined_call_operand.vmem [shape: f32[128,128], index: 3, kind: input, shape index: {}]   ;;  %s1513_s4 = inlined_call_operand.vmem [shape: f32[1,128], index: 4, kind: input, shape index: {}]   ;;  %s1514_s5 = inlined_call_operand.vmem [shape: f32[128,8], index: 5, kind: input, shape index: {}]   ;;  %s1515_s6 = inlined_call_operand.vmem [shape: f32[1,8], index: 6, kind: input, shape index: {}]   ;;  %s1516_s7 = inlined_call_operand.vmem [shape: f32[256,8], index: 7, kind: output, shape index: {}]  }
   0x1 LB: > { %s940_s25 = sadd.s32 4294967295, %s1267_s24   ;;  %p944_p0 = scmp.ge.s32.totalorder %s1267_s24, 1  ;;  %s1267_s24 = sphi %s1309_s24, %s17_s24  }
   0x2   : > { %p238_p1 = scmp.lt.s32.totalorder %s1267_s24, 3 }
   0x4   : > { %p239_p2 = pnand %p944_p0, %p238_p1 }
   0x5   : > { %s945_s28 = sshll.u32 (!%p239_p2), %s940_s25, 4 }
   0x6   : > { %242 = sbr.rel (%p239_p2) target bundleno = 666 (0x29a), region = 48  ;;  %p271_p3 = scmp.lt.s32.totalorder (!%p239_p2), %s945_s28, 31 }
   0xb   : > { %v298_v0 = vld [vmem:[%s1510_s1] sm:$0xff]  ;;  %v531_v1 = vld [vmem:[%s1512_s3 + $0x78] sm:$0xff]  ;;  %v530_v2 = vld [vmem:[%s1512_s3 + $0x70] sm:$0xff]  ;;  %s1518_s28 = smov (!%p271_p3, %s945_s28), 31  ;;  %vm306_vm0 = vcmask 64512  }
   0xc   : > { %1051 = vmatprep.subr.mxu0 %v298_v0  ;;  %1077 = vmatprep.subr.mxu1 %v531_v1  ;;  %v529_v3 = vld [vmem:[%s1512_s3 + $0x68] sm:$0xff]  ;;  %v528_v4 = vld [vmem:[%s1512_s3 + $0x60] sm:$0xff]  ;;  %s946_s14 = sshll.u32 %s1518_s28, 3  ;;  %v527_v5 = vld [vmem:[%s1512_s3 + $0x58] sm:$0xff] }
   0xd   : > { %1052 = vmatpush3.msra.mxu0 %v298_v0  ;;  %1078 = vmatpush3.msra.mxu1 %v531_v1  ;;  %s1340_s17 = scalar_lea.vmem %s1509_s0, %s946_s14  ;;  %v526_v9 = vld [vmem:[%s1512_s3 + $0x50] sm:$0xff]  ;;  %v525_v23 = vld [vmem:[%s1512_s3 + $0x48] sm:$0xff]  ;;  %v524_v24 = vld [vmem:[%s1512_s3 + $0x40] sm:$0xff]  ;;  %s1472_s22 = scalar_lea.vmem %s1516_s7, %s946_s14 }
   0xe   : > { %1079 = vmatprep.subr.mxu1 %v530_v2  ;;  %v282_v6 = vld [vmem:[%s1340_s17] sm:$0xff]  ;;  %v283_v7 = vld [vmem:[%s1340_s17 + $0x8] sm:$0xff]  ;;  %v284_v8 = vld [vmem:[%s1340_s17 + $0x10] sm:$0xff] }
   0xf   : > { %1080 = vmatpush3.msra.mxu1 %v530_v2  ;;  %1053 = vmatprep.mubr.msk.f32.mxu0 %vm306_vm0, %v282_v6  ;;  %v285_v10 = vld [vmem:[%s1340_s17 + $0x18] sm:$0xff]  ;;  %v286_v11 = vld [vmem:[%s1340_s17 + $0x20] sm:$0xff]  ;;  %v287_v12 = vld [vmem:[%s1340_s17 + $0x28] sm:$0xff] }
  0x10   : > { %1081 = vmatprep.subr.mxu1 %v529_v3  ;;  %1054 = vmatmul.mubr.msk.f32.vlgmr.msra.gmra.mxu0 %vm306_vm0, %v283_v7  ;;  %v288_v13 = vld [vmem:[%s1340_s17 + $0x30] sm:$0xff]  ;;  %v289_v14 = vld [vmem:[%s1340_s17 + $0x38] sm:$0xff]  ;;  %v290_v15 = vld [vmem:[%s1340_s17 + $0x40] sm:$0xff] }
  0x11   : > { %1082 = vmatpush3.msra.mxu1 %v529_v3  ;;  %1056 = vmatprep.mubr.msk.f32.mxu0 %vm306_vm0, %v284_v8  ;;  %v291_v16 = vld [vmem:[%s1340_s17 + $0x48] sm:$0xff]  ;;  %v292_v17 = vld [vmem:[%s1340_s17 + $0x50] sm:$0xff]  ;;  %v293_v18 = vld [vmem:[%s1340_s17 + $0x58] sm:$0xff] }
  0x12   : > { %1083 = vmatprep.subr.mxu1 %v528_v4  ;;  %v294_v19 = vld [vmem:[%s1340_s17 + $0x60] sm:$0xff]  ;;  %v295_v20 = vld [vmem:[%s1340_s17 + $0x68] sm:$0xff]  ;;  %v296_v21 = vld [vmem:[%s1340_s17 + $0x70] sm:$0xff] }
  0x13   : > { %1084 = vmatpush3.msra.mxu1 %v528_v4  ;;  %v297_v22 = vld [vmem:[%s1340_s17 + $0x78] sm:$0xff]  ;;  %v522_v26 = vld [vmem:[%s1512_s3 + $0x30] sm:$0xff]  ;;  %v521_v27 = vld [vmem:[%s1512_s3 + $0x28] sm:$0xff] }
  0x14   : > { %1085 = vmatprep.subr.mxu1 %v527_v5  ;;  %1057 = vmatmul.mubr.msk.f32.gmra.mxu0 %vm306_vm0, %v285_v10  ;;  %v523_v25 = vld [vmem:[%s1512_s3 + $0x38] sm:$0xff]  ;;  %v520_v28 = vld [vmem:[%s1512_s3 + $0x20] sm:$0xff]  ;;  %v518_v30 = vld [vmem:[%s1512_s3 + $0x10] sm:$0xff] }
  0x15   : > { %1086 = vmatpush3.msra.mxu1 %v527_v5  ;;  %1059 = vmatprep.mubr.msk.f32.mxu0 %vm306_vm0, %v286_v11  ;;  %v519_v29 = vld [vmem:[%s1512_s3 + $0x18] sm:$0xff]  ;;  %v517_v31 = vld [vmem:[%s1512_s3 + $0x8] sm:$0xff]  ;;  %v516_v32 = vld [vmem:[%s1512_s3] sm:$0xff] }
  0x16   : > { %1087 = vmatprep.subr.mxu1 %v526_v9  ;;  %v715_v33 = vld [vmem:[%s1514_s5 + $0x78] sm:$0xff]  ;;  %v714_v34 = vld [vmem:[%s1514_s5 + $0x70] sm:$0xff]  ;;  %v713_v35 = vld [vmem:[%s1514_s5 + $0x68] sm:$0xff] }
  0x17   : > { %1088 = vmatpush3.msra.mxu1 %v526_v9  ;;  %1133 = vmatprep.subr.mxu0 %v715_v33  ;;  %v712_v36 = vld [vmem:[%s1514_s5 + $0x60] sm:$0xff]  ;;  %v711_v37 = vld [vmem:[%s1514_s5 + $0x58] sm:$0xff]  ;;  %v710_v38 = vld [vmem:[%s1514_s5 + $0x50] sm:$0xff] }
  0x18   : > { %1060 = vmatmul.mubr.msk.f32.gmra.mxu0 %vm306_vm0, %v287_v12  ;;  %1089 = vmatprep.subr.mxu1 %v525_v23  ;;  %v709_v39 = vld [vmem:[%s1514_s5 + $0x48] sm:$0xff]  ;;  %v949_v40 = vld [vmem:[%s1511_s2] ss:$0 sm:$0xff] }
  0x19   : > { %1062 = vmatprep.mubr.msk.f32.mxu0 %vm306_vm0, %v288_v13  ;;  %1090 = vmatpush3.msra.mxu1 %v525_v23 }
  0x1a   : > { %1091 = vmatprep.subr.mxu1 %v524_v24  ;;  %1134 = vmatpush3.msra.mxu0 %v715_v33  ;;  %v700_v33 = vld [vmem:[%s1514_s5] sm:$0xff] }
  0x1b   : > { %1092 = vmatpush3.msra.mxu1 %v524_v24  ;;  %1135 = vmatprep.subr.mxu0 %v714_v34 }
  0x1c   : > { %1063 = vmatmul.mubr.msk.f32.gmra.mxu0 %vm306_vm0, %v289_v14  ;;  %1093 = vmatprep.subr.mxu1 %v523_v25 }
  0x1d   : > { %1065 = vmatprep.mubr.msk.f32.mxu0 %vm306_vm0, %v290_v15  ;;  %1094 = vmatpush3.msra.mxu1 %v523_v25  ;;  %v708_v25 = vld [vmem:[%s1514_s5 + $0x40] sm:$0xff] }
  0x1e   : > { %1095 = vmatprep.subr.mxu1 %v522_v26  ;;  %1136 = vmatpush3.msra.mxu0 %v714_v34  ;;  %v966_v34 = vld [vmem:[%s1513_s4] ss:$0 sm:$0xff] }
  0x1f   : > { %1096 = vmatpush3.msra.mxu1 %v522_v26  ;;  %1137 = vmatprep.subr.mxu0 %v713_v35  ;;  %v707_v26 = vld [vmem:[%s1514_s5 + $0x38] sm:$0xff] }
  0x20   : > { %1066 = vmatmul.mubr.msk.f32.gmra.mxu0 %vm306_vm0, %v291_v16  ;;  %1097 = vmatprep.subr.mxu1 %v521_v27 }
  0x21   : > { %1068 = vmatprep.mubr.msk.f32.mxu0 %vm306_vm0, %v292_v17  ;;  %1098 = vmatpush3.msra.mxu1 %v521_v27  ;;  %v706_v27 = vld [vmem:[%s1514_s5 + $0x30] sm:$0xff] }
  0x22   : > { %1099 = vmatprep.subr.mxu1 %v520_v28  ;;  %1138 = vmatpush3.msra.mxu0 %v713_v35 }
  0x23   : > { %1100 = vmatpush3.msra.mxu1 %v520_v28  ;;  %1139 = vmatprep.subr.mxu0 %v712_v36  ;;  %v705_v28 = vld [vmem:[%s1514_s5 + $0x28] sm:$0xff] }
  0x24   : > { %1069 = vmatmul.mubr.msk.f32.gmra.mxu0 %vm306_vm0, %v293_v18  ;;  %1101 = vmatprep.subr.mxu1 %v519_v29 }
  0x25   : > { %1071 = vmatprep.mubr.msk.f32.mxu0 %vm306_vm0, %v294_v19  ;;  %1102 = vmatpush3.msra.mxu1 %v519_v29  ;;  %v704_v29 = vld [vmem:[%s1514_s5 + $0x20] sm:$0xff] }
  0x26   : > { %1103 = vmatprep.subr.mxu1 %v518_v30  ;;  %1140 = vmatpush3.msra.mxu0 %v712_v36 }
  0x27   : > { %1104 = vmatpush3.msra.mxu1 %v518_v30  ;;  %1141 = vmatprep.subr.mxu0 %v711_v37  ;;  %v703_v30 = vld [vmem:[%s1514_s5 + $0x18] sm:$0xff] }
  0x28   : > { %1072 = vmatmul.mubr.msk.f32.gmra.mxu0 %vm306_vm0, %v295_v20  ;;  %1105 = vmatprep.subr.mxu1 %v517_v31 }
  0x29   : > { %1074 = vmatprep.mubr.msk.f32.mxu0 %vm306_vm0, %v296_v21  ;;  %1106 = vmatpush3.msra.mxu1 %v517_v31  ;;  %v702_v31 = vld [vmem:[%s1514_s5 + $0x10] sm:$0xff] }
  0x2a   : > { %1107 = vmatprep.subr.mxu1 %v516_v32  ;;  %1142 = vmatpush3.msra.mxu0 %v711_v37 }
  0x2b   : > { %1108 = vmatpush3.msra.mxu1 %v516_v32  ;;  %1143 = vmatprep.subr.mxu0 %v710_v38  ;;  %v701_v32 = vld [vmem:[%s1514_s5 + $0x8] sm:$0xff] }
  0x2c   : > { %1075 = vmatmul.mubr.msk.f32.gmra.mxu0 %vm306_vm0, %v297_v22 }
  0x2d   : > { %1144 = vmatpush3.msra.mxu0 %v710_v38 }
  0x2e   : > { %1145 = vmatprep.subr.mxu0 %v709_v39 }
  0x2f   : > { %1146 = vmatpush3.msra.mxu0 %v709_v39 }
  0x30   : > { %1147 = vmatprep.subr.mxu0 %v708_v25 }
  0x31   : > { %1148 = vmatpush3.msra.mxu0 %v708_v25 }
  0x32   : > { %1149 = vmatprep.subr.mxu0 %v707_v26 }
  0x33   : > { %1150 = vmatpush3.msra.mxu0 %v707_v26 }
  0x34   : > { %1151 = vmatprep.subr.mxu0 %v706_v27 }
  0x35   : > { %1152 = vmatpush3.msra.mxu0 %v706_v27 }
  0x36   : > { %1153 = vmatprep.subr.mxu0 %v705_v28 }
  0x37   : > { %1154 = vmatpush3.msra.mxu0 %v705_v28 }
  0x38   : > { %1155 = vmatprep.subr.mxu0 %v704_v29 }
  0x39   : > { %1156 = vmatpush3.msra.mxu0 %v704_v29 }
  0x3a   : > { %1157 = vmatprep.subr.mxu0 %v703_v30 }
  0x3b   : > { %1158 = vmatpush3.msra.mxu0 %v703_v30 }
  0x3c   : > { %1159 = vmatprep.subr.mxu0 %v702_v31 }
  0x3d   : > { %1160 = vmatpush3.msra.mxu0 %v702_v31 }
  0x3e   : > { %1161 = vmatprep.subr.mxu0 %v701_v32 }
  0x3f   : > { %1162 = vmatpush3.msra.mxu0 %v701_v32 }
  0x40   : > { %1163 = vmatprep.subr.mxu0 %v700_v33 }
  0x41   : > { %1164 = vmatpush3.msra.mxu0 %v700_v33 }
  0xd0   : > { %v1055_v41 = vpop.f32.mrf.mxu0 }
  0xd1   : > { %v427_v42 = vadd.f32 %v1055_v41, %v949_v40 }
  0xd2   : > { %v421_v43 = vpop.f32.mrf.mxu0 }
  0xd3   : > { %v422_v44 = vadd.f32 %v949_v40, %v421_v43 }
  0xd4   : > { %v1058_v45 = vpop.f32.mrf.mxu0 }
  0xd5   : > { %1197 = vtanh.f32 %v422_v44  ;;  %v437_v46 = vadd.f32 %v1058_v45, %v949_v40 }
  0xd6   : > { %1199 = vtanh.f32 %v427_v42  ;;  %v431_v47 = vpop.f32.mrf.mxu0 }
  0xd7   : > { %v432_v48 = vadd.f32 %v949_v40, %v431_v47 }
  0xd8   : > { %v1061_v49 = vpop.f32.mrf.mxu0 }
  0xd9   : > { %1201 = vtanh.f32 %v432_v48  ;;  %v447_v50 = vadd.f32 %v1061_v49, %v949_v40 }
  0xda   : > { %1203 = vtanh.f32 %v437_v46  ;;  %v441_v51 = vpop.f32.mrf.mxu0 }
  0xdb   : > { %v442_v52 = vadd.f32 %v949_v40, %v441_v51 }
  0xdc   : > { %v1064_v53 = vpop.f32.mrf.mxu0 }
  0xdd   : > { %1205 = vtanh.f32 %v442_v52  ;;  %v457_v54 = vadd.f32 %v1064_v53, %v949_v40 }
  0xde   : > { %1207 = vtanh.f32 %v447_v50  ;;  %v451_v55 = vpop.f32.mrf.mxu0 }
  0xdf   : > { %v452_v56 = vadd.f32 %v949_v40, %v451_v55 }
  0xe0   : > { %v1067_v57 = vpop.f32.mrf.mxu0 }
  0xe1   : > { %1209 = vtanh.f32 %v452_v56  ;;  %v467_v59 = vadd.f32 %v1067_v57, %v949_v40 }
  0xe2   : > { %v1198_v58 = vpop.eup %1197  ;;  %1211 = vtanh.f32 %v457_v54  ;;  %v461_v60 = vpop.f32.mrf.mxu0 }
  0xe3   : > { %v1200_v61 = vpop.eup %1199  ;;  %v462_v62 = vadd.f32 %v949_v40, %v461_v60  ;;  %1109 = vmatprep.mubr.f32.mxu1 %v1198_v58 }
  0xe4   : > { %v1070_v63 = vpop.f32.mrf.mxu0  ;;  %1110 = vmatmul.mubr.f32.vlgmr.msra.gmra.mxu1 %v1200_v61 }
  0xe5   : > { %1213 = vtanh.f32 %v462_v62  ;;  %v477_v1 = vadd.f32 %v1070_v63, %v949_v40 }
  0xe6   : > { %v1202_v0 = vpop.eup %1201  ;;  %1215 = vtanh.f32 %v467_v59  ;;  %v471_v2 = vpop.f32.mrf.mxu0 }
  0xe7   : > { %v1204_v3 = vpop.eup %1203  ;;  %v472_v4 = vadd.f32 %v949_v40, %v471_v2  ;;  %1112 = vmatprep.mubr.f32.mxu1 %v1202_v0 }
  0xe8   : > { %v1073_v5 = vpop.f32.mrf.mxu0  ;;  %1113 = vmatmul.mubr.f32.gmra.mxu1 %v1204_v3 }
  0xe9   : > { %1217 = vtanh.f32 %v472_v4  ;;  %v487_v7 = vadd.f32 %v1073_v5, %v949_v40 }
  0xea   : > { %v1206_v6 = vpop.eup %1205  ;;  %1219 = vtanh.f32 %v477_v1  ;;  %v481_v8 = vpop.f32.mrf.mxu0 }
  0xeb   : > { %v1208_v9 = vpop.eup %1207  ;;  %v482_v10 = vadd.f32 %v949_v40, %v481_v8  ;;  %1115 = vmatprep.mubr.f32.mxu1 %v1206_v6 }
  0xec   : > { %v1076_v11 = vpop.f32.mrf.mxu0  ;;  %1116 = vmatmul.mubr.f32.gmra.mxu1 %v1208_v9 }
  0xed   : > { %1221 = vtanh.f32 %v482_v10  ;;  %v497_v13 = vadd.f32 %v1076_v11, %v949_v40 }
  0xee   : > { %v1210_v12 = vpop.eup %1209  ;;  %1223 = vtanh.f32 %v487_v7  ;;  %v491_v14 = vpop.f32.mrf.mxu0 }
  0xef   : > { %v1212_v15 = vpop.eup %1211  ;;  %v492_v16 = vadd.f32 %v949_v40, %v491_v14  ;;  %1118 = vmatprep.mubr.f32.mxu1 %v1210_v12 }
  0xf0   : > { %1119 = vmatmul.mubr.f32.gmra.mxu1 %v1212_v15 }
  0xf1   : > { %1225 = vtanh.f32 %v492_v16 }
  0xf2   : > { %v1214_v17 = vpop.eup %1213  ;;  %1227 = vtanh.f32 %v497_v13 }
  0xf3   : > { %v1216_v18 = vpop.eup %1215  ;;  %1121 = vmatprep.mubr.f32.mxu1 %v1214_v17 }
  0xf4   : > { %1122 = vmatmul.mubr.f32.gmra.mxu1 %v1216_v18 }
  0xf6   : > { %v1218_v19 = vpop.eup %1217 }
  0xf7   : > { %v1220_v20 = vpop.eup %1219  ;;  %1124 = vmatprep.mubr.f32.mxu1 %v1218_v19  ;;  %v967_v19 = vld [vmem:[%s1515_s6] ss:$0 sm:$0xff] }
  0xf8   : > { %1125 = vmatmul.mubr.f32.gmra.mxu1 %v1220_v20 }
  0xfa   : > { %v1222_v21 = vpop.eup %1221 }
  0xfb   : > { %v1224_v22 = vpop.eup %1223  ;;  %1127 = vmatprep.mubr.f32.mxu1 %v1222_v21 }
  0xfc   : > { %1128 = vmatmul.mubr.f32.gmra.mxu1 %v1224_v22 }
  0xfe   : > { %v1226_v23 = vpop.eup %1225 }
  0xff   : > { %v1228_v24 = vpop.eup %1227  ;;  %1130 = vmatprep.mubr.f32.mxu1 %v1226_v23 }
 0x100   : > { %1131 = vmatmul.mubr.f32.gmra.mxu1 %v1228_v24 }
 0x1a4   : > { %v1111_v35 = vpop.f32.mrf.mxu1 }
 0x1a5   : > { %v611_v36 = vadd.f32 %v1111_v35, %v966_v34 }
 0x1a6   : > { %v605_v37 = vpop.f32.mrf.mxu1 }
 0x1a7   : > { %v606_v38 = vadd.f32 %v966_v34, %v605_v37 }
 0x1a8   : > { %v1114_v39 = vpop.f32.mrf.mxu1 }
 0x1a9   : > { %1229 = vtanh.f32 %v606_v38  ;;  %v621_v40 = vadd.f32 %v1114_v39, %v966_v34 }
 0x1aa   : > { %1231 = vtanh.f32 %v611_v36  ;;  %v615_v41 = vpop.f32.mrf.mxu1 }
 0x1ab   : > { %v616_v42 = vadd.f32 %v966_v34, %v615_v41 }
 0x1ac   : > { %v1117_v43 = vpop.f32.mrf.mxu1 }
 0x1ad   : > { %1233 = vtanh.f32 %v616_v42  ;;  %v631_v44 = vadd.f32 %v1117_v43, %v966_v34 }
 0x1ae   : > { %1235 = vtanh.f32 %v621_v40  ;;  %v625_v45 = vpop.f32.mrf.mxu1 }
 0x1af   : > { %v626_v46 = vadd.f32 %v966_v34, %v625_v45 }
 0x1b0   : > { %v1120_v47 = vpop.f32.mrf.mxu1 }
 0x1b1   : > { %1237 = vtanh.f32 %v626_v46  ;;  %v641_v48 = vadd.f32 %v1120_v47, %v966_v34 }
 0x1b2   : > { %1239 = vtanh.f32 %v631_v44  ;;  %v635_v49 = vpop.f32.mrf.mxu1 }
 0x1b3   : > { %v636_v50 = vadd.f32 %v966_v34, %v635_v49 }
 0x1b4   : > { %v1123_v51 = vpop.f32.mrf.mxu1 }
 0x1b5   : > { %1241 = vtanh.f32 %v636_v50  ;;  %v651_v53 = vadd.f32 %v1123_v51, %v966_v34 }
 0x1b6   : > { %v1230_v52 = vpop.eup %1229  ;;  %1243 = vtanh.f32 %v641_v48  ;;  %v645_v54 = vpop.f32.mrf.mxu1 }
 0x1b7   : > { %v1232_v55 = vpop.eup %1231  ;;  %v646_v56 = vadd.f32 %v966_v34, %v645_v54  ;;  %1165 = vmatprep.mubr.f32.mxu0 %v1230_v52 }
 0x1b8   : > { %v1126_v57 = vpop.f32.mrf.mxu1  ;;  %1166 = vmatmul.mubr.f32.vlgmr.msra.gmra.mxu0 %v1232_v55 }
 0x1b9   : > { %1245 = vtanh.f32 %v646_v56  ;;  %v661_v59 = vadd.f32 %v1126_v57, %v966_v34 }
 0x1ba   : > { %v1234_v58 = vpop.eup %1233  ;;  %1247 = vtanh.f32 %v651_v53  ;;  %v655_v60 = vpop.f32.mrf.mxu1 }
 0x1bb   : > { %v1236_v61 = vpop.eup %1235  ;;  %v656_v62 = vadd.f32 %v966_v34, %v655_v60  ;;  %1168 = vmatprep.mubr.f32.mxu0 %v1234_v58 }
 0x1bc   : > { %v1129_v63 = vpop.f32.mrf.mxu1  ;;  %1169 = vmatmul.mubr.f32.gmra.mxu0 %v1236_v61 }
 0x1bd   : > { %1249 = vtanh.f32 %v656_v62  ;;  %v671_v1 = vadd.f32 %v1129_v63, %v966_v34 }
 0x1be   : > { %v1238_v0 = vpop.eup %1237  ;;  %1251 = vtanh.f32 %v661_v59  ;;  %v665_v2 = vpop.f32.mrf.mxu1 }
 0x1bf   : > { %v1240_v3 = vpop.eup %1239  ;;  %v666_v4 = vadd.f32 %v966_v34, %v665_v2  ;;  %1171 = vmatprep.mubr.f32.mxu0 %v1238_v0 }
 0x1c0   : > { %v1132_v5 = vpop.f32.mrf.mxu1  ;;  %1172 = vmatmul.mubr.f32.gmra.mxu0 %v1240_v3 }
 0x1c1   : > { %1253 = vtanh.f32 %v666_v4  ;;  %v681_v7 = vadd.f32 %v1132_v5, %v966_v34 }
 0x1c2   : > { %v1242_v6 = vpop.eup %1241  ;;  %1255 = vtanh.f32 %v671_v1  ;;  %v675_v8 = vpop.f32.mrf.mxu1 }
 0x1c3   : > { %v1244_v9 = vpop.eup %1243  ;;  %v676_v10 = vadd.f32 %v966_v34, %v675_v8  ;;  %1174 = vmatprep.mubr.f32.mxu0 %v1242_v6 }
 0x1c4   : > { %1175 = vmatmul.mubr.f32.gmra.mxu0 %v1244_v9 }
 0x1c5   : > { %1257 = vtanh.f32 %v676_v10 }
 0x1c6   : > { %v1246_v11 = vpop.eup %1245  ;;  %1259 = vtanh.f32 %v681_v7 }
 0x1c7   : > { %v1248_v12 = vpop.eup %1247  ;;  %1177 = vmatprep.mubr.f32.mxu0 %v1246_v11 }
 0x1c8   : > { %1178 = vmatmul.mubr.f32.gmra.mxu0 %v1248_v12 }
 0x1ca   : > { %v1250_v13 = vpop.eup %1249 }
 0x1cb   : > { %v1252_v14 = vpop.eup %1251  ;;  %1180 = vmatprep.mubr.f32.mxu0 %v1250_v13 }
 0x1cc   : > { %1181 = vmatmul.mubr.f32.gmra.mxu0 %v1252_v14 }
 0x1ce   : > { %v1254_v15 = vpop.eup %1253 }
 0x1cf   : > { %v1256_v16 = vpop.eup %1255  ;;  %1183 = vmatprep.mubr.f32.mxu0 %v1254_v15 }
 0x1d0   : > { %1184 = vmatmul.mubr.f32.gmra.mxu0 %v1256_v16 }
 0x1d2   : > { %v1258_v17 = vpop.eup %1257 }
 0x1d3   : > { %v1260_v18 = vpop.eup %1259  ;;  %1186 = vmatprep.mubr.f32.mxu0 %v1258_v17 }
 0x1d4   : > { %1187 = vmatmul.mubr.f32.gmra.mxu0 %v1260_v18 }
 0x278   : > { %v1167_v20 = vpop.f32.mrf.mxu0 }
 0x279   : > { %v795_v21 = vadd.f32 %v1167_v20, %v967_v19 }
 0x27a   : > { %v789_v22 = vpop.f32.mrf.mxu0 }
 0x27b   : > { %869 = vst.msk [vmem:[%s1472_s22 + $0x8] sm:$0xff] %vm306_vm0, %v795_v21  ;;  %v790_v23 = vadd.f32 %v967_v19, %v789_v22 }
 0x27c   : > { %v1170_v24 = vpop.f32.mrf.mxu0 }
 0x27d   : > { %868 = vst.msk [vmem:[%s1472_s22] sm:$0xff] %vm306_vm0, %v790_v23  ;;  %v805_v25 = vadd.f32 %v1170_v24, %v967_v19 }
 0x27e   : > { %v799_v26 = vpop.f32.mrf.mxu0 }
 0x27f   : > { %871 = vst.msk [vmem:[%s1472_s22 + $0x18] sm:$0xff] %vm306_vm0, %v805_v25  ;;  %v800_v27 = vadd.f32 %v967_v19, %v799_v26 }
 0x280   : > { %v1173_v28 = vpop.f32.mrf.mxu0 }
 0x281   : > { %870 = vst.msk [vmem:[%s1472_s22 + $0x10] sm:$0xff] %vm306_vm0, %v800_v27  ;;  %v815_v29 = vadd.f32 %v1173_v28, %v967_v19 }
 0x282   : > { %v809_v30 = vpop.f32.mrf.mxu0 }
 0x283   : > { %873 = vst.msk [vmem:[%s1472_s22 + $0x28] sm:$0xff] %vm306_vm0, %v815_v29  ;;  %v810_v31 = vadd.f32 %v967_v19, %v809_v30 }
 0x284   : > { %v1176_v32 = vpop.f32.mrf.mxu0 }
 0x285   : > { %872 = vst.msk [vmem:[%s1472_s22 + $0x20] sm:$0xff] %vm306_vm0, %v810_v31  ;;  %v825_v33 = vadd.f32 %v1176_v32, %v967_v19 }
 0x286   : > { %v819_v34 = vpop.f32.mrf.mxu0 }
 0x287   : > { %875 = vst.msk [vmem:[%s1472_s22 + $0x38] sm:$0xff] %vm306_vm0, %v825_v33  ;;  %v820_v35 = vadd.f32 %v967_v19, %v819_v34 }
 0x288   : > { %v1179_v36 = vpop.f32.mrf.mxu0 }
 0x289   : > { %874 = vst.msk [vmem:[%s1472_s22 + $0x30] sm:$0xff] %vm306_vm0, %v820_v35  ;;  %v835_v37 = vadd.f32 %v1179_v36, %v967_v19 }
 0x28a   : > { %v829_v38 = vpop.f32.mrf.mxu0 }
 0x28b   : > { %877 = vst.msk [vmem:[%s1472_s22 + $0x48] sm:$0xff] %vm306_vm0, %v835_v37  ;;  %v830_v39 = vadd.f32 %v967_v19, %v829_v38 }
 0x28c   : > { %v1182_v40 = vpop.f32.mrf.mxu0 }
 0x28d   : > { %876 = vst.msk [vmem:[%s1472_s22 + $0x40] sm:$0xff] %vm306_vm0, %v830_v39  ;;  %v845_v41 = vadd.f32 %v1182_v40, %v967_v19 }
 0x28e   : > { %v839_v42 = vpop.f32.mrf.mxu0 }
 0x28f   : > { %879 = vst.msk [vmem:[%s1472_s22 + $0x58] sm:$0xff] %vm306_vm0, %v845_v41  ;;  %v840_v43 = vadd.f32 %v967_v19, %v839_v42 }
 0x290   : > { %v1185_v44 = vpop.f32.mrf.mxu0 }
 0x291   : > { %878 = vst.msk [vmem:[%s1472_s22 + $0x50] sm:$0xff] %vm306_vm0, %v840_v43  ;;  %v855_v45 = vadd.f32 %v1185_v44, %v967_v19 }
 0x292   : > { %v849_v46 = vpop.f32.mrf.mxu0 }
 0x293   : > { %881 = vst.msk [vmem:[%s1472_s22 + $0x68] sm:$0xff] %vm306_vm0, %v855_v45  ;;  %v850_v47 = vadd.f32 %v967_v19, %v849_v46 }
 0x294   : > { %v1188_v48 = vpop.f32.mrf.mxu0 }
 0x295   : > { %880 = vst.msk [vmem:[%s1472_s22 + $0x60] sm:$0xff] %vm306_vm0, %v850_v47  ;;  %v865_v49 = vadd.f32 %v1188_v48, %v967_v19 }
 0x296   : > { %v859_v50 = vpop.f32.mrf.mxu0 }
 0x297   : > { %883 = vst.msk [vmem:[%s1472_s22 + $0x78] sm:$0xff] %vm306_vm0, %v865_v49  ;;  %v860_v51 = vadd.f32 %v967_v19, %v859_v50 }
 0x299   : > { %882 = vst.msk [vmem:[%s1472_s22 + $0x70] sm:$0xff] %vm306_vm0, %v860_v51 }
 0x29a PF: > { %s17_s24 = sadd.s32 1, %s1267_s24  }
 0x29b   : > { %p14_p4 = scmp.ge.s32.totalorder %s17_s24, 4  }
 0x29d   :  { %16 = sbr.rel (!%p14_p4) target bundleno = 1 (0x1), region = 78 }

</bundles_post_ra>
